<compile_context>
chip_gen: v6e
topology: v6e:2x2x1
jax: 0.10.0
libtpu: 0.0.40
codegen_flags: <defaults>
</compile_context>

<pallas_src>
import functools

import jax
import jax.numpy as jnp
from jax import lax
from jax.experimental import pallas as pl
from jax.experimental.pallas import tpu as pltpu


# ---------------------------------------------------------------------------
# Pass 1: pooled sum/max per channel + gate MLP  ->  gate (N, C, 1)
# ---------------------------------------------------------------------------
def _pool_gate_kernel(x_ref, w1_ref, b1_ref, w2_ref, b2_ref, gate_ref,
                      sum_sc, max_sc, *, hw, tile, needs_mask):
    s = pl.program_id(1)

    @pl.when(s == 0)
    def _init():
        sum_sc[...] = jnp.zeros_like(sum_sc)
        max_sc[...] = jnp.full_like(max_sc, -jnp.inf)

    x = x_ref[0]  # (C, tile) fp32

    if needs_mask:
        # Only the last spatial tile can be partial; mask pad region with
        # 0 for the sum and -inf for the max.
        lane = s * tile + lax.broadcasted_iota(jnp.int32, x.shape, 1)
        valid = lane < hw
        xs = jnp.where(valid, x, 0.0)
        xm = jnp.where(valid, x, -jnp.inf)
    else:
        xs = x
        xm = x

    # Accumulate 128-lane chunks with pure VPU adds/maxes into (C, 128)
    # scratch; avoids a cross-lane XLU reduce per tile.
    acc_s = sum_sc[...]
    acc_m = max_sc[...]
    if tile >= 128:
        for j in range(tile // 128):
            sl = slice(j * 128, (j + 1) * 128)
            acc_s = acc_s + xs[:, sl]
            acc_m = jnp.maximum(acc_m, xm[:, sl])
    else:
        acc_s = acc_s + xs
        acc_m = jnp.maximum(acc_m, xm)
    sum_sc[...] = acc_s
    max_sc[...] = acc_m

    @pl.when(s == pl.num_programs(1) - 1)
    def _finalize():
        c = x_ref.shape[1]
        # Single cross-lane reduce per batch element.
        mean_col = jnp.sum(sum_sc[...], axis=1, keepdims=True) * (1.0 / float(hw))  # (C, 1)
        max_col = jnp.max(max_sc[...], axis=1, keepdims=True)                        # (C, 1)

        # Batched MLP: avg and max are the two columns of a (C, 2) matrix.
        col = lax.broadcasted_iota(jnp.int32, (c, 2), 1)
        v = jnp.where(col == 0, mean_col, max_col)                                    # (C, 2)

        h = jnp.dot(w1_ref[...], v, preferred_element_type=jnp.float32) + b1_ref[...]  # (C/16, 2)
        h = jnp.maximum(h, 0.0)
        o = jnp.dot(w2_ref[...], h, preferred_element_type=jnp.float32) + b2_ref[...]  # (C, 2)
        o = jax.nn.sigmoid(o)
        # mlp(avg) + mlp(max) == sum over the two columns; then the outer sigmoid.
        gate = jax.nn.sigmoid(jnp.sum(o, axis=1, keepdims=True))                       # (C, 1)
        gate_ref[0] = gate


# ---------------------------------------------------------------------------
# Pass 2: lane-dense broadcast multiply x * gate
# ---------------------------------------------------------------------------
def _scale_kernel(x_ref, gate_ref, o_ref):
    o_ref[...] = x_ref[...] * gate_ref[...]   # (1, C, TILE) * (1, C, 1)


def _choose_spatial_tile(hw, c, per_buffer_bytes=1 << 20):
    """Lane tile along flattened H*W: multiple of 128 (lane-dense stores),
    sized so double-buffered in+out tiles stay well inside the scoped VMEM
    limit on every TPU generation (incl. v7x's 64 MiB / 32 MiB scoped)."""
    if hw < 128:
        return hw                                   # full extent == lane dim
    cap = max(128, (per_buffer_bytes // (c * 4)) // 128 * 128)
    cap = min(cap, 2048)
    return min(cap, (hw // 128) * 128)


def cam_forward(x, w1, b1, w2, b2, *, spatial_tile=None):
    """CAM forward.

    x : (N, C, H, W) float32
    w1: (C//16, C), b1: (C//16,)   -- PyTorch nn.Linear(C, C//16) orientation
    w2: (C, C//16), b2: (C,)       -- PyTorch nn.Linear(C//16, C) orientation
    """
    N, C, H, W = x.shape
    HW = H * W
    hidden = w1.shape[0]

    x_flat = x.reshape(N, C, HW)
    b1c = b1.reshape(hidden, 1)
    b2c = b2.reshape(C, 1)

    ts = spatial_tile if spatial_tile is not None else _choose_spatial_tile(HW, C)
    assert ts == HW or ts % 128 == 0, "spatial tile must be multiple of 128 or full H*W"
    n_s = pl.cdiv(HW, ts)
    needs_mask = (HW % ts) != 0
    scratch_lanes = 128 if ts >= 128 else ts

    vmem_limit = 32 * 1024 * 1024

    # ------------------------- pass 1: pooling + gate ----------------------
    pool_cost = pl.CostEstimate(
        flops=2 * N * C * HW + 8 * N * C * hidden,
        transcendentals=3 * N * C,
        bytes_accessed=N * C * HW * 4 + N * C * 4
        + int(w1.size + b1.size + w2.size + b2.size) * 4,
    )
    gate = pl.pallas_call(
        functools.partial(_pool_gate_kernel, hw=HW, tile=ts, needs_mask=needs_mask),
        out_shape=jax.ShapeDtypeStruct((N, C, 1), jnp.float32),
        grid=(N, n_s),
        in_specs=[
            pl.BlockSpec((1, C, ts), lambda n, s: (n, 0, s)),
            pl.BlockSpec((hidden, C), lambda n, s: (0, 0)),
            pl.BlockSpec((hidden, 1), lambda n, s: (0, 0)),
            pl.BlockSpec((C, hidden), lambda n, s: (0, 0)),
            pl.BlockSpec((C, 1), lambda n, s: (0, 0)),
        ],
        out_specs=pl.BlockSpec((1, C, 1), lambda n, s: (n, 0, 0)),
        scratch_shapes=[
            pltpu.VMEM((C, scratch_lanes), jnp.float32),   # running sum
            pltpu.VMEM((C, scratch_lanes), jnp.float32),   # running max
        ],
        compiler_params=pltpu.CompilerParams(
            dimension_semantics=("parallel", "arbitrary"),
            vmem_limit_bytes=vmem_limit),
        cost_estimate=pool_cost,
    )(x_flat, w1, b1c, w2, b2c)

    # --------------------------- pass 2: scaling ---------------------------
    scale_cost = pl.CostEstimate(
        flops=N * C * HW,
        transcendentals=0,
        bytes_accessed=2 * N * C * HW * 4 + N * C * 4,
    )
    out = pl.pallas_call(
        _scale_kernel,
        out_shape=jax.ShapeDtypeStruct((N, C, HW), x.dtype),
        grid=(N, n_s),
        in_specs=[
            pl.BlockSpec((1, C, ts), lambda n, s: (n, 0, s)),
            pl.BlockSpec((1, C, 1), lambda n, s: (n, 0, 0)),
        ],
        out_specs=pl.BlockSpec((1, C, ts), lambda n, s: (n, 0, s)),
        compiler_params=pltpu.CompilerParams(
            dimension_semantics=("parallel", "parallel"),
            vmem_limit_bytes=vmem_limit),
        cost_estimate=scale_cost,
    )(x_flat, gate)

    return out.reshape(N, C, H, W)


def cam_reference(x, w1, b1, w2, b2):
    """Pure-JAX reference mirroring the PyTorch module."""
    avg = jnp.mean(x, axis=(2, 3))
    mx = jnp.max(x, axis=(2, 3))

    def mlp(v):
        h = jnp.maximum(v @ w1.T + b1, 0.0)
        return jax.nn.sigmoid(h @ w2.T + b2)

    y = jax.nn.sigmoid(mlp(avg) + mlp(mx))
    return x * y[:, :, None, None]


if __name__ == "__main__":
    # in_channels must be >= 16 so the hidden dim C//16 is at least 1.
    N, C, H, W = 2, 128, 16, 16
    hidden = C // 16  # 8

    key = jax.random.PRNGKey(0)
    kx, k1, k2, k3, k4 = jax.random.split(key, 5)

    x = jax.random.normal(kx, (N, C, H, W), dtype=jnp.float32)

    # Parameters in PyTorch nn.Linear (out_features, in_features) orientation.
    s1 = 1.0 / jnp.sqrt(jnp.float32(C))
    s2 = 1.0 / jnp.sqrt(jnp.float32(hidden))
    w1 = jax.random.uniform(k1, (hidden, C), jnp.float32, -s1, s1)
    b1 = jax.random.uniform(k2, (hidden,), jnp.float32, -s1, s1)
    w2 = jax.random.uniform(k3, (C, hidden), jnp.float32, -s2, s2)
    b2 = jax.random.uniform(k4, (C,), jnp.float32, -s2, s2)

    # Case 1: multi-tile spatial grid (2 lane-dense tiles of 128).
    out = jax.block_until_ready(cam_forward(x, w1, b1, w2, b2, spatial_tile=128))
    ref = cam_reference(x, w1, b1, w2, b2)
    assert out.shape == (N, C, H, W)
    assert jnp.allclose(out, ref, atol=1e-5, rtol=1e-5), "mismatch vs reference (case 1)"

    # Case 2: H*W = 144 is not a multiple of 128 -> exercises the masked
    # partial last tile (0-pad for the mean, -inf-pad for the max).
    x2 = jax.random.normal(kx, (N, C, 12, 12), dtype=jnp.float32)
    out2 = jax.block_until_ready(cam_forward(x2, w1, b1, w2, b2))
    ref2 = cam_reference(x2, w1, b1, w2, b2)
    assert jnp.allclose(out2, ref2, atol=1e-5, rtol=1e-5), "mismatch vs reference (case 2)"

    print("KERNEL_OK")
</pallas_src>

<mosaic_0001>
module attributes {stable_mosaic.version = 11 : i64} {
  func.func @_pool_gate_kernel(%arg0: i32, %arg1: i32, %arg2: memref<1x128x128xf32, #tpu.memory_space<vmem>>, %arg3: memref<8x128xf32, #tpu.memory_space<vmem>>, %arg4: memref<8x1xf32, #tpu.memory_space<vmem>>, %arg5: memref<128x8xf32, #tpu.memory_space<vmem>>, %arg6: memref<128x1xf32, #tpu.memory_space<vmem>>, %arg7: memref<1x128x1xf32, #tpu.memory_space<vmem>>, %arg8: memref<128x128xf32, #tpu.memory_space<vmem>>, %arg9: memref<128x128xf32, #tpu.memory_space<vmem>>) attributes {dimension_semantics = [#tpu.dimension_semantics<parallel>, #tpu.dimension_semantics<arbitrary>], iteration_bounds = array<i64: 2, 2>, scalar_prefetch = 0 : i64, scratch_operands = 2 : i64, tpu.core_type = #tpu.core_type<tc>, window_params = [{transform_indices = @transform_0, window_bounds = array<i64: 1, 128, 128>}, {pipeline_mode = #tpu.pipeline_mode<synchronous>, transform_indices = @transform_1, window_bounds = array<i64: 8, 128>}, {pipeline_mode = #tpu.pipeline_mode<synchronous>, transform_indices = @transform_2, window_bounds = array<i64: 8, 1>}, {pipeline_mode = #tpu.pipeline_mode<synchronous>, transform_indices = @transform_3, window_bounds = array<i64: 128, 8>}, {pipeline_mode = #tpu.pipeline_mode<synchronous>, transform_indices = @transform_4, window_bounds = array<i64: 128, 1>}, {transform_indices = @transform_5, window_bounds = array<i64: 1, 128, 1>}]} {
    %c0_i32 = arith.constant 0 : i32
    %0 = arith.cmpi eq, %arg1, %c0_i32 : i32
    %1 = arith.extui %0 : i1 to i32
    %c0_i32_0 = arith.constant 0 : i32
    %2 = arith.cmpi ne, %1, %c0_i32_0 : i32
    scf.if %2 {
      %cst = arith.constant 0.000000e+00 : f32
      %14 = vector.broadcast %cst : f32 to vector<128x128xf32>
      %c0_12 = arith.constant 0 : index
      %c0_13 = arith.constant 0 : index
      %15 = vector.load %arg8[%c0_12, %c0_13] : memref<128x128xf32, #tpu.memory_space<vmem>>, vector<128x128xf32>
      tpu.vector_store %arg8[%c0_12, %c0_13], %14 {strides = array<i32>} : memref<128x128xf32, #tpu.memory_space<vmem>>, vector<128x128xf32>,
      %cst_14 = arith.constant 0xFF800000 : f32
      %16 = vector.broadcast %cst_14 : f32 to vector<128x128xf32>
      %c0_15 = arith.constant 0 : index
      %c0_16 = arith.constant 0 : index
      %17 = vector.load %arg9[%c0_15, %c0_16] : memref<128x128xf32, #tpu.memory_space<vmem>>, vector<128x128xf32>
      tpu.vector_store %arg9[%c0_15, %c0_16], %16 {strides = array<i32>} : memref<128x128xf32, #tpu.memory_space<vmem>>, vector<128x128xf32>,
    } else {
    }
    %c0 = arith.constant 0 : index
    %c0_1 = arith.constant 0 : index
    %c0_2 = arith.constant 0 : index
    %3 = vector.load %arg2[%c0, %c0_1, %c0_2] : memref<1x128x128xf32, #tpu.memory_space<vmem>>, vector<1x128x128xf32>
    %4 = vector.shape_cast %3 : vector<1x128x128xf32> to vector<128x128xf32>
    %c0_3 = arith.constant 0 : index
    %c0_4 = arith.constant 0 : index
    %5 = vector.load %arg8[%c0_3, %c0_4] : memref<128x128xf32, #tpu.memory_space<vmem>>, vector<128x128xf32>
    %c0_5 = arith.constant 0 : index
    %c0_6 = arith.constant 0 : index
    %6 = vector.load %arg9[%c0_5, %c0_6] : memref<128x128xf32, #tpu.memory_space<vmem>>, vector<128x128xf32>
    %7 = arith.addf %5, %4 : vector<128x128xf32>
    %8 = arith.maximumf %6, %4 : vector<128x128xf32>
    %c0_7 = arith.constant 0 : index
    %c0_8 = arith.constant 0 : index
    %9 = vector.load %arg8[%c0_7, %c0_8] : memref<128x128xf32, #tpu.memory_space<vmem>>, vector<128x128xf32>
    tpu.vector_store %arg8[%c0_7, %c0_8], %7 {strides = array<i32>} : memref<128x128xf32, #tpu.memory_space<vmem>>, vector<128x128xf32>,
    %c0_9 = arith.constant 0 : index
    %c0_10 = arith.constant 0 : index
    %10 = vector.load %arg9[%c0_9, %c0_10] : memref<128x128xf32, #tpu.memory_space<vmem>>, vector<128x128xf32>
    tpu.vector_store %arg9[%c0_9, %c0_10], %8 {strides = array<i32>} : memref<128x128xf32, #tpu.memory_space<vmem>>, vector<128x128xf32>,
    %c1_i32 = arith.constant 1 : i32
    %11 = arith.cmpi eq, %arg1, %c1_i32 : i32
    %12 = arith.extui %11 : i1 to i32
    %c0_i32_11 = arith.constant 0 : i32
    %13 = arith.cmpi ne, %12, %c0_i32_11 : i32
    scf.if %13 {
      %c0_12 = arith.constant 0 : index
      %c0_13 = arith.constant 0 : index
      %14 = vector.load %arg8[%c0_12, %c0_13] : memref<128x128xf32, #tpu.memory_space<vmem>>, vector<128x128xf32>
      %cst = arith.constant dense<0.000000e+00> : vector<128xf32>
      %15 = vector.multi_reduction <add>, %14, %cst [1] : vector<128x128xf32> to vector<128xf32>
      %16 = vector.shape_cast %15 : vector<128xf32> to vector<128x1xf32>
      %cst_14 = arith.constant 3.906250e-03 : f32
      %17 = vector.broadcast %cst_14 : f32 to vector<128x1xf32>
      %18 = arith.mulf %16, %17 : vector<128x1xf32>
      %c0_15 = arith.constant 0 : index
      %c0_16 = arith.constant 0 : index
      %19 = vector.load %arg9[%c0_15, %c0_16] : memref<128x128xf32, #tpu.memory_space<vmem>>, vector<128x128xf32>
      %cst_17 = arith.constant dense<0xFF800000> : vector<128xf32>
      %20 = vector.multi_reduction <maximumf>, %19, %cst_17 [1] : vector<128x128xf32> to vector<128xf32>
      %21 = vector.shape_cast %20 : vector<128xf32> to vector<128x1xf32>
      %22 = tpu.iota {dimensions = array<i32: 1>} : vector<128x2xi32>
      %c0_i32_18 = arith.constant 0 : i32
      %23 = vector.broadcast %c0_i32_18 : i32 to vector<128x2xi32>
      %24 = arith.cmpi eq, %22, %23 : vector<128x2xi32>
      %25 = vector.shape_cast %18 : vector<128x1xf32> to vector<128x1xf32>
      %26 = vector.broadcast %25 : vector<128x1xf32> to vector<128x2xf32>
      %27 = vector.shape_cast %21 : vector<128x1xf32> to vector<128x1xf32>
      %28 = vector.broadcast %27 : vector<128x1xf32> to vector<128x2xf32>
      %29 = arith.select %24, %26, %28 : vector<128x2xi1>, vector<128x2xf32>
      %c0_19 = arith.constant 0 : index
      %c0_20 = arith.constant 0 : index
      %30 = vector.load %arg3[%c0_19, %c0_20] : memref<8x128xf32, #tpu.memory_space<vmem>>, vector<8x128xf32>
      %cst_21 = arith.constant dense<0.000000e+00> : vector<8x2xf32>
      %31 = tpu.matmul %30, %29, %cst_21 {dimension_numbers = #tpu.dot_dimension_numbers<[1], [0], [0], [1], [0, 0, 1, 1], [], []>} : vector<8x128xf32>, vector<128x2xf32>, vector<8x2xf32> -> vector<8x2xf32>
      %c0_22 = arith.constant 0 : index
      %c0_23 = arith.constant 0 : index
      %32 = vector.load %arg4[%c0_22, %c0_23] : memref<8x1xf32, #tpu.memory_space<vmem>>, vector<8x1xf32>
      %33 = vector.broadcast %32 : vector<8x1xf32> to vector<8x2xf32>
      %34 = arith.addf %31, %33 : vector<8x2xf32>
      %cst_24 = arith.constant 0.000000e+00 : f32
      %35 = vector.broadcast %cst_24 : f32 to vector<8x2xf32>
      %36 = arith.maximumf %34, %35 : vector<8x2xf32>
      %c0_25 = arith.constant 0 : index
      %c0_26 = arith.constant 0 : index
      %37 = vector.load %arg5[%c0_25, %c0_26] : memref<128x8xf32, #tpu.memory_space<vmem>>, vector<128x8xf32>
      %cst_27 = arith.constant dense<0.000000e+00> : vector<128x2xf32>
      %38 = tpu.matmul %37, %36, %cst_27 {dimension_numbers = #tpu.dot_dimension_numbers<[1], [0], [0], [1], [0, 0, 1, 1], [], []>} : vector<128x8xf32>, vector<8x2xf32>, vector<128x2xf32> -> vector<128x2xf32>
      %c0_28 = arith.constant 0 : index
      %c0_29 = arith.constant 0 : index
      %39 = vector.load %arg6[%c0_28, %c0_29] : memref<128x1xf32, #tpu.memory_space<vmem>>, vector<128x1xf32>
      %40 = vector.broadcast %39 : vector<128x1xf32> to vector<128x2xf32>
      %41 = arith.addf %38, %40 : vector<128x2xf32>
      %42 = arith.negf %41 : vector<128x2xf32>
      %43 = math.exp %42 : vector<128x2xf32>
      %cst_30 = arith.constant 1.000000e+00 : f32
      %44 = vector.broadcast %cst_30 : f32 to vector<128x2xf32>
      %45 = arith.addf %44, %43 : vector<128x2xf32>
      %46 = arith.divf %44, %45 : vector<128x2xf32>
      %cst_31 = arith.constant dense<0.000000e+00> : vector<128xf32>
      %47 = vector.multi_reduction <add>, %46, %cst_31 [1] : vector<128x2xf32> to vector<128xf32>
      %48 = vector.shape_cast %47 : vector<128xf32> to vector<128x1xf32>
      %49 = arith.negf %48 : vector<128x1xf32>
      %50 = math.exp %49 : vector<128x1xf32>
      %cst_32 = arith.constant 1.000000e+00 : f32
      %51 = vector.broadcast %cst_32 : f32 to vector<128x1xf32>
      %52 = arith.addf %51, %50 : vector<128x1xf32>
      %53 = arith.divf %51, %52 : vector<128x1xf32>
      %c0_33 = arith.constant 0 : index
      %c0_34 = arith.constant 0 : index
      %c0_35 = arith.constant 0 : index
      %54 = vector.load %arg7[%c0_33, %c0_34, %c0_35] : memref<1x128x1xf32, #tpu.memory_space<vmem>>, vector<1x128x1xf32>
      %55 = vector.shape_cast %54 : vector<1x128x1xf32> to vector<128x1xf32>
      %56 = vector.shape_cast %53 : vector<128x1xf32> to vector<1x128x1xf32>
      tpu.vector_store %arg7[%c0_33, %c0_34, %c0_35], %56 {strides = array<i32>} : memref<1x128x1xf32, #tpu.memory_space<vmem>>, vector<1x128x1xf32>,
    } else {
    }
    return
  }
  func.func @transform_0(%arg0: i32, %arg1: i32) -> (i32, i32, i32) {
    %c0_i32 = arith.constant 0 : i32
    %c0_i32_0 = arith.constant 0 : i32
    return %arg0, %c0_i32, %arg1 : i32, i32, i32
  }
  func.func @transform_1(%arg0: i32, %arg1: i32) -> (i32, i32) {
    %c0_i32 = arith.constant 0 : i32
    %c0_i32_0 = arith.constant 0 : i32
    %c0_i32_1 = arith.constant 0 : i32
    return %c0_i32, %c0_i32_0 : i32, i32
  }
  func.func @transform_2(%arg0: i32, %arg1: i32) -> (i32, i32) {
    %c0_i32 = arith.constant 0 : i32
    %c0_i32_0 = arith.constant 0 : i32
    %c0_i32_1 = arith.constant 0 : i32
    return %c0_i32, %c0_i32_0 : i32, i32
  }
  func.func @transform_3(%arg0: i32, %arg1: i32) -> (i32, i32) {
    %c0_i32 = arith.constant 0 : i32
    %c0_i32_0 = arith.constant 0 : i32
    %c0_i32_1 = arith.constant 0 : i32
    return %c0_i32, %c0_i32_0 : i32, i32
  }
  func.func @transform_4(%arg0: i32, %arg1: i32) -> (i32, i32) {
    %c0_i32 = arith.constant 0 : i32
    %c0_i32_0 = arith.constant 0 : i32
    %c0_i32_1 = arith.constant 0 : i32
    return %c0_i32, %c0_i32_0 : i32, i32
  }
  func.func @transform_5(%arg0: i32, %arg1: i32) -> (i32, i32, i32) {
    %c0_i32 = arith.constant 0 : i32
    %c0_i32_0 = arith.constant 0 : i32
    %c0_i32_1 = arith.constant 0 : i32
    return %arg0, %c0_i32, %c0_i32_0 : i32, i32, i32
  }
}

</mosaic_0001>

<bundles_post_ra>
// kernel: tpu_custom_call.1
= control target key start
LH: loop header
LB: loop body
LE: loop exit
PB: predicated region body
PF: predicated region fallthrough
CT: control target
= control target key end

     0   :  { %10 = vsyncpa [#allocation5], 0  ;;  %s2183_s0 = inlined_call_operand.hbm [shape: f32[2,128,256], index: 0, kind: input, shape index: {}]   ;;  %s2184_s1 = inlined_call_operand.vmem [shape: f32[8,128], index: 1, kind: input, shape index: {}]   ;;  %s2185_s2 = inlined_call_operand.vmem [shape: f32[8,1], index: 2, kind: input, shape index: {}]   ;;  %s2186_s3 = inlined_call_operand.vmem [shape: f32[128,8], index: 3, kind: input, shape index: {}]   ;;  %s2187_s4 = inlined_call_operand.vmem [shape: f32[128,1], index: 4, kind: input, shape index: {}]   ;;  %s2188_s5 = inlined_call_operand.vmem [shape: f32[2,128,1], index: 5, kind: output, shape index: {}]  }
   0x1   :  { %12 = vsyncpa [#allocation5 + $0x1], 0  ;;  %s1768_s18 = smov 0   ;;  %s1770_s19 = smov 0  }
   0x2   :  { %s1772_s20 = smov 0   ;;  %s1774_s21 = smov 0  }
   0x3   :  { %s1776_s22 = smov 0   ;;  %s1778_s23 = smov 0  }
   0x4   :  { %s1780_s24 = smov 0   ;;  %s1782_s25 = smov 0  }
   0x5 LB: > { %s1265_s26 = sadd.s32 4294967295, %s1727_s25   ;;  %s27_s27 = sadd.s32 1, %s1719_s23  ;;  %s1727_s25 = sphi %s1782_s25, %s18_s25   ;;  %s1723_s24 = sphi %s1780_s24, %s2204_s24   ;;  %s1719_s23 = sphi %s1778_s23, %s2203_s23   ;;  %s1715_s22 = sphi %s1776_s22, %s2202_s22   ;;  %s1711_s21 = sphi %s1774_s21, %s2201_s21   ;;  %s1707_s20 = sphi %s1772_s20, %s2200_s20   ;;  %s1703_s19 = sphi %s1770_s19, %s2199_s19   ;;  %s1699_s18 = sphi %s1768_s18, %s2198_s18  }
   0x6   : > { %p28_p0 = scmp.ge.s32.totalorder %s27_s27, 2  ;;  %s30_s28 = sadd.s32 1, %s1723_s24 }
   0x7   : > { %s39_s29 = sadd.s32 1, %s1707_s20  ;;  %p46_p1 = scmp.ne.s32.totalorder %s1707_s20, %s1703_s19 }
   0x8   : > { %s2206_s27 = smov (%p28_p0, %s27_s27), 0  ;;  %s2208_s28 = smov (!%p28_p0, %s30_s28), %s1723_s24 }
   0x9   : > { %2191 = sst [smem:[#allocation7_spill]] %s2206_s27  ;;  %s35_s30 = ssub.s32 %s1719_s23, %s2206_s27 }
   0xa   : > { %p47_p2 = scmp.eq.s32.totalorder %s1727_s25, 0  ;;  %p32_p3 = scmp.ge.s32.totalorder %s2208_s28, 2 }
   0xb   : > { %p52_p4 = scmp.ne.s32.totalorder %s1703_s19, %s1699_s18  ;;  %p53_p6 = scmp.eq.s32.totalorder %s1265_s26, 0 }
   0xc   : > { %p1819_p5 = por %p47_p2, %p46_p1  ;;  %s2210_s28 = smov (%p32_p3, %s2208_s28), 0 }
   0xd   : > { %2193 = sst [smem:[#allocation8_spill]] %s2210_s28  ;;  %p1825_p7 = por %p53_p6, %p52_p4 }
   0xe   : > { %s34_s8 = ssub.s32 %s1723_s24, %s2210_s28  ;;  %p1430_p8 = scmp.lt.s32.totalorder %s1727_s25, 4 }
   0xf   : > { %s36_s9 = sor.u32 %s35_s30, %s34_s8  ;;  %s198_s10 = sand.u32 1, %s1707_s20  }
  0x10   : > { %p37_p9 = scmp.eq.s32.totalorder %s36_s9, 0  ;;  %s1269_s11 = sshll.u32 %s198_s10, 7 }
  0x11   : > { %s1270_s12 = sshll.u32 %s1723_s24, 5  ;;  %s202_s16 = scalar_lea.vmem [#allocation4], %s1269_s11 }
  0x12   : > { %s1835_s13 = scalar_select %p37_p9, %s1707_s20, %s39_s29  }
  0x13   : > { %s207_s14 = sadd.s32 %s1719_s23, %s1270_s12  ;;  %s210_s17 = sshll.u32 %s202_s16, 4  ;;  %s211_s17 = int_to_ptr.vmem [resolvable:$true] %s210_s17 }
  0x14   : > { %s1271_s15 = sshll.u32 %s207_s14, 7  ;;  %p1845_p10 = pnand %p1430_p8, %p1819_p5 }
  0x15   : > { %s209_s27 = scalar_lea.hbm %s2183_s0, %s1271_s15  ;;  %p1272_p11 = scmp.ge.s32.totalorder %s1727_s25, 1 }
  0x16   : > { %s199_s30 = scalar_lea.sflag [#allocation5], %s198_s10  ;;  %p1635_p12 = pneg %p1845_p10 }
  0x17   : > { %s1646_s29 = scalar_lea.vmem %s211_s17, 2048  ;;  %s1729_s8 = smov [#allocation4]  }
  0x18   : > { %p1647_p13 = scmp.ne.s32.totalorder %s211_s17, %s1646_s29  ;;  %s1651_s9 = sshll.u32 %s1729_s8, 4  ;;  %s1652_s9 = int_to_ptr.vmem [resolvable:$false] %s1651_s9 }
  0x19   : > { %s1653_s11 = scalar_lea.vmem %s1652_s9, 4096  ;;  %p1654_p2 = scmp.lt.s32.totalorder %s211_s17, %s1652_s9 }
  0x1a   : > { %p1649_p0 = pnand %p1647_p13, %p1635_p12  ;;  %p1655_p3 = scmp.lt.s32.totalorder %s1653_s11, %s1646_s29 }
  0x1c   : > { %p1650_p1 = pneg %p1649_p0  ;;  %p1656_p4 = por %p1655_p3, %p1654_p2 }
  0x1e   : > { %p1657_p5 = pnand %p1656_p4, %p1650_p1 }
  0x20   : > { %1660 = shalt.err (!%p1657_p5)
}
  0x21   : > { %s1730_s6 = smov 256   ;;  %s1731_s10 = smov 128  }
  0x22   : > { %s1732_s12 = smov 8   ;;  %p218_p6 = scmp.lt.s32.totalorder %s1727_s25, 5 }
  0x23   : > { %1429 = dma.hbm_to_vmem [thread:$0]  (!%p1845_p10), %s209_s27, 2048, %s211_s17, %s199_s30, %s1730_s6, %s1731_s10, %s1732_s12  }
  0x24   : > { %p219_p8 = pnand %p1272_p11, %p218_p6 }
  0x25   : > { %s224_s14 = sand.u32 (!%p219_p8), 1, %s1703_s19  }
  0x26   : > { %222 = sbr.rel (%p219_p8) target bundleno = 930 (0x3a2), region = 40  ;;  %s1273_s15 = sshll.u32 (!%p219_p8), %s224_s14, 7 }
  0x27   : > { %s225_s16 = scalar_lea.sflag (!%p219_p8), [#allocation5], %s224_s14  ;;  %s1858_s18 = scalar_lea.vmem (!%p219_p8), [#allocation4], %s1273_s15 }
  0x2b   : > { %1694 = dma.done.wait (%p1825_p7), %s225_s16, 2048  }
  0x2c   : > { %1696 = vsyncadd (%p1825_p7), %s225_s16, 4294965248  ;;  %p255_p9 = scmp.lt.s32.totalorder %s1715_s22, 1  ;;  %p1276_p10 = scmp.ne.s32.totalorder %s1711_s21, 0 }
  0x2e   : > { %s2212_s22 = smov (!%p255_p9, %s1715_s22), 1  ;;  %263 = sbr.rel (%p1276_p10) target bundleno = 68 (0x44), region = 48 }
  0x2f   : > { %s1328_s27 = sshll.u32 %s2212_s22, 7 }
  0x30   : > { %s1869_s26 = scalar_lea.vmem %s2188_s5, %s1328_s27 }
  0x33   : > { %v1733_v0 = vmov 0.0   ;;  %v1734_v1 = vmov -inf  }
  0x34   : > { %264 = vst [vmem:[#allocation2 + $0x30] sm:$0xff] %v1733_v0  ;;  %265 = vst [vmem:[#allocation2] sm:$0xff] %v1733_v0 }
  0x35   : > { %266 = vst [vmem:[#allocation2 + $0x58] sm:$0xff] %v1733_v0  ;;  %267 = vst [vmem:[#allocation2 + $0x18] sm:$0xff] %v1733_v0 }
  0x36   : > { %268 = vst [vmem:[#allocation2 + $0x50] sm:$0xff] %v1733_v0  ;;  %269 = vst [vmem:[#allocation2 + $0x68] sm:$0xff] %v1733_v0 }
  0x37   : > { %270 = vst [vmem:[#allocation2 + $0x8] sm:$0xff] %v1733_v0  ;;  %271 = vst [vmem:[#allocation2 + $0x48] sm:$0xff] %v1733_v0 }
  0x38   : > { %272 = vst [vmem:[#allocation2 + $0x40] sm:$0xff] %v1733_v0  ;;  %273 = vst [vmem:[#allocation2 + $0x20] sm:$0xff] %v1733_v0 }
  0x39   : > { %274 = vst [vmem:[#allocation2 + $0x10] sm:$0xff] %v1733_v0  ;;  %275 = vst [vmem:[#allocation2 + $0x38] sm:$0xff] %v1733_v0 }
  0x3a   : > { %276 = vst [vmem:[#allocation2 + $0x60] sm:$0xff] %v1733_v0  ;;  %277 = vst [vmem:[#allocation2 + $0x70] sm:$0xff] %v1733_v0 }
  0x3b   : > { %278 = vst [vmem:[#allocation2 + $0x78] sm:$0xff] %v1733_v0  ;;  %279 = vst [vmem:[#allocation2 + $0x28] sm:$0xff] %v1733_v0 }
  0x3c   : > { %280 = vst [vmem:[#allocation3 + $0x28] sm:$0xff] %v1734_v1  ;;  %281 = vst [vmem:[#allocation3 + $0x68] sm:$0xff] %v1734_v1 }
  0x3d   : > { %282 = vst [vmem:[#allocation3 + $0x10] sm:$0xff] %v1734_v1  ;;  %283 = vst [vmem:[#allocation3 + $0x40] sm:$0xff] %v1734_v1 }
  0x3e   : > { %284 = vst [vmem:[#allocation3 + $0x48] sm:$0xff] %v1734_v1  ;;  %285 = vst [vmem:[#allocation3 + $0x30] sm:$0xff] %v1734_v1 }
  0x3f   : > { %286 = vst [vmem:[#allocation3 + $0x70] sm:$0xff] %v1734_v1  ;;  %287 = vst [vmem:[#allocation3 + $0x38] sm:$0xff] %v1734_v1 }
  0x40   : > { %288 = vst [vmem:[#allocation3 + $0x20] sm:$0xff] %v1734_v1  ;;  %289 = vst [vmem:[#allocation3 + $0x78] sm:$0xff] %v1734_v1 }
  0x41   : > { %290 = vst [vmem:[#allocation3 + $0x18] sm:$0xff] %v1734_v1  ;;  %291 = vst [vmem:[#allocation3 + $0x58] sm:$0xff] %v1734_v1 }
  0x42   : > { %292 = vst [vmem:[#allocation3] sm:$0xff] %v1734_v1  ;;  %293 = vst [vmem:[#allocation3 + $0x8] sm:$0xff] %v1734_v1 }
  0x43   : > { %294 = vst [vmem:[#allocation3 + $0x60] sm:$0xff] %v1734_v1  ;;  %295 = vst [vmem:[#allocation3 + $0x50] sm:$0xff] %v1734_v1 }
  0x44 PF: > { %v1873_v2 = vld [vmem:[%s1858_s18] sm:$0xff]  ;;  %v312_v3 = vld [vmem:[#allocation2 + $0x30] sm:$0xff]  ;;  %v1876_v4 = vld [vmem:[%s1858_s18 + $0x8] sm:$0xff]  ;;  %p1277_p7 = scmp.ne.s32.totalorder %s1711_s21, 1 }
  0x45   : > { %v344_v5 = vadd.f32 %v312_v3, %v1873_v2  ;;  %v313_v6 = vld [vmem:[#allocation2] sm:$0xff]  ;;  %v1880_v7 = vld [vmem:[%s1858_s18 + $0x10] sm:$0xff]  ;;  %v314_v8 = vld [vmem:[#allocation2 + $0x58] sm:$0xff] }
  0x46   : > { %v345_v9 = vadd.f32 %v313_v6, %v1876_v4  ;;  %v346_v10 = vadd.f32 %v314_v8, %v1880_v7  ;;  %v1885_v11 = vld [vmem:[%s1858_s18 + $0x18] sm:$0xff]  ;;  %v1888_v13 = vld [vmem:[%s1858_s18 + $0x20] sm:$0xff]  ;;  %v316_v15 = vld [vmem:[#allocation2 + $0x50] sm:$0xff] }
  0x47   : > { %v315_v12 = vld [vmem:[#allocation2 + $0x18] sm:$0xff]  ;;  %376 = vst [vmem:[#allocation2 + $0x30] sm:$0xff] %v344_v5  ;;  %v1892_v16 = vld [vmem:[%s1858_s18 + $0x28] sm:$0xff]  ;;  %v348_v18 = vadd.f32 %v316_v15, %v1888_v13  ;;  %v1897_v20 = vld [vmem:[%s1858_s18 + $0x30] sm:$0xff] }
  0x48   : > { %v347_v14 = vadd.f32 %v315_v12, %v1885_v11  ;;  %v317_v17 = vld [vmem:[#allocation2 + $0x68] sm:$0xff]  ;;  %377 = vst [vmem:[#allocation2] sm:$0xff] %v345_v9  ;;  %378 = vst [vmem:[#allocation2 + $0x58] sm:$0xff] %v346_v10  ;;  %v1900_v22 = vld [vmem:[%s1858_s18 + $0x38] sm:$0xff] }
  0x49   : > { %v349_v19 = vadd.f32 %v317_v17, %v1892_v16  ;;  %v318_v21 = vld [vmem:[#allocation2 + $0x8] sm:$0xff]  ;;  %v1904_v25 = vld [vmem:[%s1858_s18 + $0x40] sm:$0xff]  ;;  %380 = vst [vmem:[#allocation2 + $0x50] sm:$0xff] %v348_v18  ;;  %v1912_v31 = vld [vmem:[%s1858_s18 + $0x50] sm:$0xff] }
  0x4a   : > { %379 = vst [vmem:[#allocation2 + $0x18] sm:$0xff] %v347_v14  ;;  %v350_v23 = vadd.f32 %v318_v21, %v1897_v20  ;;  %v319_v24 = vld [vmem:[#allocation2 + $0x48] sm:$0xff]  ;;  %v320_v26 = vld [vmem:[#allocation2 + $0x40] sm:$0xff]  ;;  %v322_v33 = vld [vmem:[#allocation2 + $0x10] sm:$0xff] }
  0x4b   : > { %381 = vst [vmem:[#allocation2 + $0x68] sm:$0xff] %v349_v19  ;;  %v351_v27 = vadd.f32 %v319_v24, %v1900_v22  ;;  %v352_v28 = vadd.f32 %v320_v26, %v1904_v25  ;;  %v1909_v29 = vld [vmem:[%s1858_s18 + $0x48] sm:$0xff]  ;;  %v321_v30 = vld [vmem:[#allocation2 + $0x20] sm:$0xff]  ;;  %v1916_v34 = vld [vmem:[%s1858_s18 + $0x58] sm:$0xff]  ;;  %v354_v36 = vadd.f32 %v322_v33, %v1912_v31 }
  0x4c   : > { %382 = vst [vmem:[#allocation2 + $0x8] sm:$0xff] %v350_v23  ;;  %v353_v32 = vadd.f32 %v321_v30, %v1909_v29  ;;  %v323_v35 = vld [vmem:[#allocation2 + $0x38] sm:$0xff]  ;;  %v1921_v38 = vld [vmem:[%s1858_s18 + $0x60] sm:$0xff]  ;;  %v309_v40 = vld [vmem:[%s1858_s18 + $0x68] sm:$0xff] }
  0x4d   : > { %383 = vst [vmem:[#allocation2 + $0x48] sm:$0xff] %v351_v27  ;;  %384 = vst [vmem:[#allocation2 + $0x40] sm:$0xff] %v352_v28  ;;  %v355_v37 = vadd.f32 %v323_v35, %v1916_v34  ;;  %v324_v39 = vld [vmem:[#allocation2 + $0x60] sm:$0xff]  ;;  %v325_v42 = vld [vmem:[#allocation2 + $0x70] sm:$0xff] }
  0x4e   : > { %385 = vst [vmem:[#allocation2 + $0x20] sm:$0xff] %v353_v32  ;;  %v356_v41 = vadd.f32 %v324_v39, %v1921_v38  ;;  %v310_v43 = vld [vmem:[%s1858_s18 + $0x70] sm:$0xff]  ;;  %v326_v44 = vld [vmem:[#allocation2 + $0x78] sm:$0xff]  ;;  %386 = vst [vmem:[#allocation2 + $0x10] sm:$0xff] %v354_v36  ;;  %v357_v45 = vadd.f32 %v325_v42, %v309_v40 }
  0x4f   : > { %387 = vst [vmem:[#allocation2 + $0x38] sm:$0xff] %v355_v37  ;;  %v358_v46 = vadd.f32 %v326_v44, %v310_v43  ;;  %v311_v47 = vld [vmem:[%s1858_s18 + $0x78] sm:$0xff]  ;;  %v327_v48 = vld [vmem:[#allocation2 + $0x28] sm:$0xff]  ;;  %v330_v53 = vld [vmem:[#allocation3 + $0x10] sm:$0xff] }
  0x50   : > { %v328_v49 = vld [vmem:[#allocation3 + $0x28] sm:$0xff]  ;;  %388 = vst [vmem:[#allocation2 + $0x60] sm:$0xff] %v356_v41  ;;  %v359_v50 = vadd.f32 %v327_v48, %v311_v47  ;;  %v331_v54 = vld [vmem:[#allocation3 + $0x40] sm:$0xff]  ;;  %389 = vst [vmem:[#allocation2 + $0x70] sm:$0xff] %v357_v45  ;;  %v362_v56 = vmax.f32 %v330_v53, %v1880_v7 }
  0x51   : > { %v360_v51 = vmax.f32 %v328_v49, %v1873_v2  ;;  %v329_v52 = vld [vmem:[#allocation3 + $0x68] sm:$0xff]  ;;  %390 = vst [vmem:[#allocation2 + $0x78] sm:$0xff] %v358_v46  ;;  %v363_v57 = vmax.f32 %v331_v54, %v1885_v11  ;;  %v333_v59 = vld [vmem:[#allocation3 + $0x30] sm:$0xff]  ;;  %v335_v0 = vld [vmem:[#allocation3 + $0x38] sm:$0xff] }
  0x52   : > { %v361_v55 = vmax.f32 %v329_v52, %v1876_v4  ;;  %v332_v58 = vld [vmem:[#allocation3 + $0x48] sm:$0xff]  ;;  %v334_v60 = vld [vmem:[#allocation3 + $0x70] sm:$0xff]  ;;  %391 = vst [vmem:[#allocation2 + $0x28] sm:$0xff] %v359_v50  ;;  %v365_v62 = vmax.f32 %v333_v59, %v1892_v16  ;;  %v336_v1 = vld [vmem:[#allocation3 + $0x20] sm:$0xff]  ;;  %v367_v3 = vmax.f32 %v335_v0, %v1900_v22 }
  0x53   : > { %392 = vst [vmem:[#allocation3 + $0x28] sm:$0xff] %v360_v51  ;;  %v364_v61 = vmax.f32 %v332_v58, %v1888_v13  ;;  %v366_v63 = vmax.f32 %v334_v60, %v1897_v20  ;;  %v337_v2 = vld [vmem:[#allocation3 + $0x78] sm:$0xff]  ;;  %394 = vst [vmem:[#allocation3 + $0x10] sm:$0xff] %v362_v56  ;;  %v368_v4 = vmax.f32 %v336_v1, %v1904_v25  ;;  %v340_v8 = vld [vmem:[#allocation3] sm:$0xff] }
  0x54   : > { %393 = vst [vmem:[#allocation3 + $0x68] sm:$0xff] %v361_v55  ;;  %395 = vst [vmem:[#allocation3 + $0x40] sm:$0xff] %v363_v57  ;;  %v369_v5 = vmax.f32 %v337_v2, %v1909_v29  ;;  %v338_v6 = vld [vmem:[#allocation3 + $0x18] sm:$0xff]  ;;  %v372_v11 = vmax.f32 %v340_v8, %v1921_v38  ;;  %v341_v12 = vld [vmem:[#allocation3 + $0x8] sm:$0xff] }
  0x55   : > { %v339_v7 = vld [vmem:[#allocation3 + $0x58] sm:$0xff]  ;;  %396 = vst [vmem:[#allocation3 + $0x48] sm:$0xff] %v364_v61  ;;  %397 = vst [vmem:[#allocation3 + $0x30] sm:$0xff] %v365_v62  ;;  %v370_v9 = vmax.f32 %v338_v6, %v1912_v31  ;;  %v342_v13 = vld [vmem:[#allocation3 + $0x60] sm:$0xff]  ;;  %v373_v15 = vmax.f32 %v341_v12, %v309_v40 }
  0x56   : > { %398 = vst [vmem:[#allocation3 + $0x70] sm:$0xff] %v366_v63  ;;  %v371_v10 = vmax.f32 %v339_v7, %v1916_v34  ;;  %v343_v14 = vld [vmem:[#allocation3 + $0x50] sm:$0xff]  ;;  %399 = vst [vmem:[#allocation3 + $0x38] sm:$0xff] %v367_v3  ;;  %v374_v16 = vmax.f32 %v342_v13, %v310_v43  ;;  %411 = sbr.rel (%p1277_p7) target bundleno = 930 (0x3a2), region = 52 }
  0x57   : > { %400 = vst [vmem:[#allocation3 + $0x20] sm:$0xff] %v368_v4  ;;  %401 = vst [vmem:[#allocation3 + $0x78] sm:$0xff] %v369_v5  ;;  %v375_v17 = vmax.f32 %v343_v14, %v311_v47 }
  0x58   : > { %402 = vst [vmem:[#allocation3 + $0x18] sm:$0xff] %v370_v9  ;;  %403 = vst [vmem:[#allocation3 + $0x58] sm:$0xff] %v371_v10 }
  0x59   : > { %404 = vst [vmem:[#allocation3] sm:$0xff] %v372_v11  ;;  %405 = vst [vmem:[#allocation3 + $0x8] sm:$0xff] %v373_v15 }
  0x5a   : > { %406 = vst [vmem:[#allocation3 + $0x60] sm:$0xff] %v374_v16  ;;  %407 = vst [vmem:[#allocation3 + $0x50] sm:$0xff] %v375_v17 }
  0x5b   : > { %v427_v19 = vld [vmem:[#allocation2 + $0x28] sm:$0xff]  ;;  %v426_v20 = vld [vmem:[#allocation2 + $0x78] sm:$0xff]  ;;  %v425_v21 = vld [vmem:[#allocation2 + $0x70] sm:$0xff]  ;;  %v1735_v26 = vmov 0.0   ;;  %vm1736_vm0 = vmmov 0   ;;  %v1737_v51 = vmov 0   ;;  %v524_v57 = vlaneseq }
  0x5c   : > { %458 = vadd.xlane.f32.xlu0 %v427_v19  ;;  %v424_v23 = vld [vmem:[#allocation2 + $0x60] sm:$0xff]  ;;  %v423_v25 = vld [vmem:[#allocation2 + $0x38] sm:$0xff]  ;;  %1363 = vmatprep.subr.mxu0 %v1735_v26  ;;  %v422_v28 = vld [vmem:[#allocation2 + $0x10] sm:$0xff]  ;;  %vm733_vm2 = vcmask 64512   ;;  %vm1023_vm3 = vcmask 15360   ;;  %vm1168_vm4 = vcmask 7168  }
  0x5d   : > { %v421_v30 = vld [vmem:[#allocation2 + $0x20] sm:$0xff]  ;;  %v419_v34 = vld [vmem:[#allocation2 + $0x48] sm:$0xff]  ;;  %v483_v37 = vld [vmem:[#allocation3 + $0x38] sm:$0xff]  ;;  %1395 = vmatprep.mubr.msk.f32.mxu0 %vm1736_vm0, %v1735_v26  ;;  %1503 = vset.pattern.permute.xlu0 %v1737_v51  ;;  %v1958_v58 = vand.u32 127, %v524_v57 }
  0x5e   : > { %v420_v32 = vld [vmem:[#allocation2 + $0x40] sm:$0xff]  ;;  %v485_v33 = vld [vmem:[#allocation3 + $0x78] sm:$0xff]  ;;  %v418_v36 = vld [vmem:[#allocation2 + $0x8] sm:$0xff]  ;;  %1504 = vset.pattern.permute.xlu1 %v1737_v51 }
  0x5f   : > { %v487_v29 = vld [vmem:[#allocation3 + $0x58] sm:$0xff]  ;;  %v484_v35 = vld [vmem:[#allocation3 + $0x20] sm:$0xff]  ;;  %v417_v38 = vld [vmem:[#allocation2 + $0x68] sm:$0xff]  ;;  %vm526_vm1 = vcmp.eq.s32.totalorder %v1958_v58, 0 }
  0x60   : > { %456 = vadd.xlane.f32.xlu0 %v426_v20  ;;  %v489_v24 = vld [vmem:[#allocation3 + $0x8] sm:$0xff]  ;;  %v488_v27 = vld [vmem:[#allocation3] sm:$0xff]  ;;  %v486_v31 = vld [vmem:[#allocation3 + $0x18] sm:$0xff] }
  0x61   : > { %v491_v18 = vld [vmem:[#allocation3 + $0x50] sm:$0xff]  ;;  %v490_v22 = vld [vmem:[#allocation3 + $0x60] sm:$0xff]  ;;  %v415_v42 = vld [vmem:[#allocation2 + $0x18] sm:$0xff] }
  0x62   : > { %522 = vmax.xlane.f32.xlu1 %v491_v18  ;;  %v482_v39 = vld [vmem:[#allocation3 + $0x70] sm:$0xff]  ;;  %v480_v43 = vld [vmem:[#allocation3 + $0x48] sm:$0xff]  ;;  %v414_v44 = vld [vmem:[#allocation2 + $0x58] sm:$0xff] }
  0x63   : > { %v416_v40 = vld [vmem:[#allocation2 + $0x50] sm:$0xff]  ;;  %v479_v45 = vld [vmem:[#allocation3 + $0x40] sm:$0xff]  ;;  %v477_v49 = vld [vmem:[#allocation3 + $0x68] sm:$0xff] }
  0x64   : > { %520 = vmax.xlane.f32.xlu0 %v490_v22  ;;  %v481_v41 = vld [vmem:[#allocation3 + $0x30] sm:$0xff]  ;;  %v413_v46 = vld [vmem:[#allocation2] sm:$0xff]  ;;  %v476_v50 = vld [vmem:[#allocation3 + $0x28] sm:$0xff] }
  0x65   : > { %v478_v47 = vld [vmem:[#allocation3 + $0x10] sm:$0xff]  ;;  %v544_v52 = vld [vmem:[%s2185_s2] sm:$0xff] }
  0x66   : > { %454 = vadd.xlane.f32.xlu1 %v425_v21  ;;  %v412_v48 = vld [vmem:[#allocation2 + $0x30] sm:$0xff]  ;;  %v645_v53 = vld [vmem:[%s2187_s4 + $0x40] sm:$0xff] }
  0x67   : > { %v647_v54 = vld [vmem:[%s2187_s4 + $0x50] sm:$0xff]  ;;  %v649_v55 = vld [vmem:[%s2187_s4 + $0x60] sm:$0xff] }
  0x68   : > { %518 = vmax.xlane.f32.xlu0 %v489_v24  ;;  %v651_v56 = vld [vmem:[%s2187_s4 + $0x70] sm:$0xff] }
  0x69   : > { %v639_v58 = vld [vmem:[%s2187_s4 + $0x10] sm:$0xff] }
  0x6a   : > { %452 = vadd.xlane.f32.xlu1 %v424_v23 }
  0x6c   : > { %516 = vmax.xlane.f32.xlu0 %v488_v27 }
  0x6e   : > { %450 = vadd.xlane.f32.xlu1 %v423_v25 }
  0x70   : > { %514 = vmax.xlane.f32.xlu0 %v487_v29 }
  0x72   : > { %448 = vadd.xlane.f32.xlu1 %v422_v28 }
  0x74   : > { %512 = vmax.xlane.f32.xlu0 %v486_v31 }
  0x76   : > { %446 = vadd.xlane.f32.xlu1 %v421_v30 }
  0x78   : > { %510 = vmax.xlane.f32.xlu0 %v485_v33 }
  0x7a   : > { %444 = vadd.xlane.f32.xlu1 %v420_v32 }
  0x7c   : > { %508 = vmax.xlane.f32.xlu0 %v484_v35 }
  0x7e   : > { %442 = vadd.xlane.f32.xlu1 %v419_v34 }
  0x80   : > { %506 = vmax.xlane.f32.xlu0 %v483_v37 }
  0x82   : > { %440 = vadd.xlane.f32.xlu1 %v418_v36 }
  0x84   : > { %504 = vmax.xlane.f32.xlu0 %v482_v39 }
  0x86   : > { %438 = vadd.xlane.f32.xlu1 %v417_v38 }
  0x88   : > { %502 = vmax.xlane.f32.xlu0 %v481_v41 }
  0x8a   : > { %436 = vadd.xlane.f32.xlu1 %v416_v40 }
  0x8c   : > { %500 = vmax.xlane.f32.xlu0 %v480_v43 }
  0x8e   : > { %434 = vadd.xlane.f32.xlu1 %v415_v42 }
  0x90   : > { %498 = vmax.xlane.f32.xlu0 %v479_v45 }
  0x92   : > { %432 = vadd.xlane.f32.xlu1 %v414_v44 }
  0x94   : > { %496 = vmax.xlane.f32.xlu0 %v478_v47 }
  0x96   : > { %430 = vadd.xlane.f32.xlu1 %v413_v46 }
  0x98   : > { %494 = vmax.xlane.f32.xlu0 %v477_v49 }
  0x9a   : > { %428 = vadd.xlane.f32.xlu1 %v412_v48 }
  0x9e   : > { %492 = vmax.xlane.f32.xlu1 %v476_v50 }
  0xae   : > { %547 = vperm.xlu0 %1503, %v544_v52  }
  0xb2   : > { %695 = vperm.xlu0 %1503, %v645_v53  }
  0xb6   : > { %705 = vperm.xlu0 %1503, %v647_v54  }
  0xba   : > { %715 = vperm.xlu0 %1503, %v649_v55  }
  0xbe   : > { %725 = vperm.xlu0 %1503, %v651_v56  }
  0xe5   : > { %v459_v60 = vpop.xlane.xlu0 %458 }
  0xe6   : > { %v475_v61 = vmul.f32 0.00390625, %v459_v60  ;;  %v543_v60 = vld [vmem:[%s2184_s1] sm:$0xff] }
  0xe9   : > { %v457_v63 = vpop.xlane.xlu0 %456 }
  0xea   : > { %v474_v1 = vmul.f32 0.00390625, %v457_v63  ;;  %v637_v63 = vld [vmem:[%s2187_s4] sm:$0xff] }
  0xeb   : > { %v523_v59 = vpop.xlane.xlu1 %522  ;;  %655 = vperm.xlu1 %1504, %v637_v63  }
  0xec   : > { %v542_v62 = vsel %vm526_vm1, %v475_v61, %v523_v59 }
  0xed   : > { %1364 = vmatpush3.msra.mxu0 %v542_v62  ;;  %v521_v2 = vpop.xlane.xlu0 %520  ;;  %v621_v62 = vld [vmem:[%s2186_s3] sm:$0xff] }
  0xee   : > { %1365 = vmatprep.subr.mxu0 %v1735_v26  ;;  %v541_v4 = vsel %vm526_vm1, %v474_v1, %v521_v2  ;;  %1400 = vmatprep.mubr.msk.f32.mxu1 %vm733_vm2, %v621_v62  ;;  %v641_v1 = vld [vmem:[%s2187_s4 + $0x20] sm:$0xff]  ;;  %v642_v2 = vld [vmem:[%s2187_s4 + $0x28] sm:$0xff] }
  0xef   : > { %v455_v0 = vpop.xlane.xlu1 %454  ;;  %1366 = vmatpush3.msra.mxu0 %v541_v4  ;;  %v644_v4 = vld [vmem:[%s2187_s4 + $0x38] sm:$0xff] }
  0xf0   : > { %v473_v5 = vmul.f32 0.00390625, %v455_v0  ;;  %1367 = vmatprep.subr.mxu0 %v1735_v26  ;;  %v640_v0 = vld [vmem:[%s2187_s4 + $0x18] sm:$0xff] }
  0xf1   : > { %v519_v6 = vpop.xlane.xlu0 %518 }
  0xf2   : > { %v540_v8 = vsel %vm526_vm1, %v473_v5, %v519_v6  ;;  %v646_v5 = vld [vmem:[%s2187_s4 + $0x48] sm:$0xff]  ;;  %v648_v6 = vld [vmem:[%s2187_s4 + $0x58] sm:$0xff] }
  0xf3   : > { %v453_v3 = vpop.xlane.xlu1 %452  ;;  %1368 = vmatpush3.msra.mxu0 %v540_v8  ;;  %v652_v8 = vld [vmem:[%s2187_s4 + $0x78] sm:$0xff] }
  0xf4   : > { %v472_v9 = vmul.f32 0.00390625, %v453_v3  ;;  %1369 = vmatprep.subr.mxu0 %v1735_v26  ;;  %v643_v3 = vld [vmem:[%s2187_s4 + $0x30] sm:$0xff] }
  0xf5   : > { %v517_v10 = vpop.xlane.xlu0 %516 }
  0xf6   : > { %v539_v12 = vsel %vm526_vm1, %v472_v9, %v517_v10 }
  0xf7   : > { %v451_v7 = vpop.xlane.xlu1 %450  ;;  %1370 = vmatpush3.msra.mxu0 %v539_v12 }
  0xf8   : > { %v471_v13 = vmul.f32 0.00390625, %v451_v7  ;;  %1371 = vmatprep.subr.mxu0 %v1735_v26  ;;  %v650_v7 = vld [vmem:[%s2187_s4 + $0x68] sm:$0xff] }
  0xf9   : > { %v515_v14 = vpop.xlane.xlu0 %514 }
  0xfa   : > { %v538_v16 = vsel %vm526_vm1, %v471_v13, %v515_v14  ;;  %v622_v14 = vld [vmem:[%s2186_s3 + $0x8] sm:$0xff] }
  0xfb   : > { %v449_v11 = vpop.xlane.xlu1 %448  ;;  %1372 = vmatpush3.msra.mxu0 %v538_v16  ;;  %v624_v16 = vld [vmem:[%s2186_s3 + $0x18] sm:$0xff] }
  0xfc   : > { %v470_v17 = vmul.f32 0.00390625, %v449_v11  ;;  %1373 = vmatprep.subr.mxu0 %v1735_v26 }
  0xfd   : > { %v513_v18 = vpop.xlane.xlu0 %512 }
  0xfe   : > { %v537_v20 = vsel %vm526_vm1, %v470_v17, %v513_v18  ;;  %v625_v17 = vld [vmem:[%s2186_s3 + $0x20] sm:$0xff]  ;;  %v626_v18 = vld [vmem:[%s2186_s3 + $0x28] sm:$0xff] }
  0xff   : > { %v447_v15 = vpop.xlane.xlu1 %446  ;;  %1374 = vmatpush3.msra.mxu0 %v537_v20  ;;  %v628_v20 = vld [vmem:[%s2186_s3 + $0x38] sm:$0xff] }
 0x100   : > { %v469_v21 = vmul.f32 0.00390625, %v447_v15  ;;  %1375 = vmatprep.subr.mxu0 %v1735_v26  ;;  %v623_v15 = vld [vmem:[%s2186_s3 + $0x10] sm:$0xff] }
 0x101   : > { %v511_v22 = vpop.xlane.xlu0 %510 }
 0x102   : > { %v536_v24 = vsel %vm526_vm1, %v469_v21, %v511_v22  ;;  %v629_v21 = vld [vmem:[%s2186_s3 + $0x40] sm:$0xff]  ;;  %v630_v22 = vld [vmem:[%s2186_s3 + $0x48] sm:$0xff] }
 0x103   : > { %v445_v19 = vpop.xlane.xlu1 %444  ;;  %1376 = vmatpush3.msra.mxu0 %v536_v24  ;;  %v632_v24 = vld [vmem:[%s2186_s3 + $0x58] sm:$0xff] }
 0x104   : > { %v468_v25 = vmul.f32 0.00390625, %v445_v19  ;;  %1377 = vmatprep.subr.mxu0 %v1735_v26  ;;  %v627_v19 = vld [vmem:[%s2186_s3 + $0x30] sm:$0xff] }
 0x105   : > { %v509_v27 = vpop.xlane.xlu0 %508 }
 0x106   : > { %v535_v29 = vsel %vm526_vm1, %v468_v25, %v509_v27  ;;  %v633_v25 = vld [vmem:[%s2186_s3 + $0x60] sm:$0xff]  ;;  %v634_v27 = vld [vmem:[%s2186_s3 + $0x68] sm:$0xff] }
 0x107   : > { %v443_v23 = vpop.xlane.xlu1 %442  ;;  %1378 = vmatpush3.msra.mxu0 %v535_v29  ;;  %v636_v29 = vld [vmem:[%s2186_s3 + $0x78] sm:$0xff] }
 0x108   : > { %v467_v30 = vmul.f32 0.00390625, %v443_v23  ;;  %1379 = vmatprep.subr.mxu0 %v1735_v26  ;;  %v631_v23 = vld [vmem:[%s2186_s3 + $0x50] sm:$0xff] }
 0x109   : > { %v507_v31 = vpop.xlane.xlu0 %506 }
 0x10a   : > { %v534_v33 = vsel %vm526_vm1, %v467_v30, %v507_v31 }
 0x10b   : > { %v441_v28 = vpop.xlane.xlu1 %440  ;;  %1380 = vmatpush3.msra.mxu0 %v534_v33 }
 0x10c   : > { %v466_v34 = vmul.f32 0.00390625, %v441_v28  ;;  %1381 = vmatprep.subr.mxu0 %v1735_v26  ;;  %v635_v28 = vld [vmem:[%s2186_s3 + $0x70] sm:$0xff] }
 0x10d   : > { %v505_v35 = vpop.xlane.xlu0 %504 }
 0x10e   : > { %v533_v37 = vsel %vm526_vm1, %v466_v34, %v505_v35 }
 0x10f   : > { %v439_v32 = vpop.xlane.xlu1 %438  ;;  %1382 = vmatpush3.msra.mxu0 %v533_v37 }
 0x110   : > { %v465_v38 = vmul.f32 0.00390625, %v439_v32  ;;  %1383 = vmatprep.subr.mxu0 %v1735_v26 }
 0x111   : > { %v503_v39 = vpop.xlane.xlu0 %502 }
 0x112   : > { %v532_v41 = vsel %vm526_vm1, %v465_v38, %v503_v39 }
 0x113   : > { %v437_v36 = vpop.xlane.xlu1 %436  ;;  %1384 = vmatpush3.msra.mxu0 %v532_v41 }
 0x114   : > { %v464_v42 = vmul.f32 0.00390625, %v437_v36  ;;  %1385 = vmatprep.subr.mxu0 %v1735_v26 }
 0x115   : > { %v501_v43 = vpop.xlane.xlu0 %500 }
 0x116   : > { %v531_v45 = vsel %vm526_vm1, %v464_v42, %v501_v43 }
 0x117   : > { %v435_v40 = vpop.xlane.xlu1 %434  ;;  %1386 = vmatpush3.msra.mxu0 %v531_v45 }
 0x118   : > { %v463_v46 = vmul.f32 0.00390625, %v435_v40  ;;  %1387 = vmatprep.subr.mxu0 %v1735_v26 }
 0x119   : > { %v499_v47 = vpop.xlane.xlu0 %498 }
 0x11a   : > { %v530_v49 = vsel %vm526_vm1, %v463_v46, %v499_v47 }
 0x11b   : > { %v433_v44 = vpop.xlane.xlu1 %432  ;;  %1388 = vmatpush3.msra.mxu0 %v530_v49 }
 0x11c   : > { %v462_v50 = vmul.f32 0.00390625, %v433_v44  ;;  %1389 = vmatprep.subr.mxu0 %v1735_v26 }
 0x11d   : > { %v497_v51 = vpop.xlane.xlu0 %496 }
 0x11e   : > { %v529_v53 = vsel %vm526_vm1, %v462_v50, %v497_v51 }
 0x11f   : > { %v431_v48 = vpop.xlane.xlu1 %430  ;;  %1390 = vmatpush3.msra.mxu0 %v529_v53 }
 0x120   : > { %v461_v54 = vmul.f32 0.00390625, %v431_v48  ;;  %1391 = vmatprep.subr.mxu0 %v1735_v26 }
 0x121   : > { %v495_v56 = vpop.xlane.xlu0 %494 }
 0x122   : > { %v528_v59 = vsel %vm526_vm1, %v461_v54, %v495_v56 }
 0x123   : > { %v429_v52 = vpop.xlane.xlu1 %428  ;;  %1392 = vmatpush3.msra.mxu0 %v528_v59 }
 0x124   : > { %v460_v55 = vmul.f32 0.00390625, %v429_v52  ;;  %1393 = vmatprep.subr.mxu0 %v1735_v26  ;;  %v638_v26 = vld [vmem:[%s2187_s4 + $0x8] sm:$0xff] }
 0x125   : > { %660 = vperm.xlu1 %1504, %v638_v26  }
 0x127   : > { %v493_v57 = vpop.xlane.xlu1 %492 }
 0x128   : > { %v527_v61 = vsel %vm526_vm1, %v460_v55, %v493_v57 }
 0x129   : > { %1394 = vmatpush3.msra.mxu0 %v527_v61  ;;  %665 = vperm.xlu1 %1504, %v639_v58   ;;  %v548_v9 = vpop.permute.xlu0 %547 }
 0x12a   : > { %1396 = vmatmul.mubr.f32.vlgmr.msra.gmra.mxu0 %v543_v60 }
 0x12d   : > { %670 = vperm.xlu1 %1504, %v640_v0   ;;  %v696_v56 = vpop.permute.xlu0 %695 }
 0x131   : > { %675 = vperm.xlu1 %1504, %v641_v1  }
 0x135   : > { %680 = vperm.xlu1 %1504, %v642_v2  }
 0x139   : > { %685 = vperm.xlu1 %1504, %v643_v3   ;;  %v706_v3 = vpop.permute.xlu0 %705 }
 0x13d   : > { %690 = vperm.xlu1 %1504, %v644_v4  }
 0x141   : > { %700 = vperm.xlu1 %1504, %v646_v5  }
 0x145   : > { %710 = vperm.xlu1 %1504, %v648_v6  }
 0x149   : > { %720 = vperm.xlu1 %1504, %v650_v7  }
 0x14d   : > { %730 = vperm.xlu1 %1504, %v652_v8  }
 0x166   : > { %v656_v30 = vpop.permute.xlu1 %655 }
 0x1a0   : > { %v661_v31 = vpop.permute.xlu1 %660 }
 0x1a4   : > { %v666_v32 = vpop.permute.xlu1 %665 }
 0x1a8   : > { %v671_v33 = vpop.permute.xlu1 %670 }
 0x1ac   : > { %v676_v34 = vpop.permute.xlu1 %675 }
 0x1b0   : > { %v681_v35 = vpop.permute.xlu1 %680 }
 0x1b4   : > { %v686_v36 = vpop.permute.xlu1 %685 }
 0x1b8   : > { %v691_v42 = vpop.permute.xlu1 %690 }
 0x1bc   : > { %v701_v52 = vpop.permute.xlu1 %700 }
 0x1c0   : > { %v711_v26 = vpop.permute.xlu1 %710 }
 0x1ea   : > { %v616_v10 = vpop.f32.mrf.mxu0 }
 0x1eb   : > { %v617_v11 = vadd.f32 %v616_v10, %v548_v9 }
 0x1ec   : > { %v1397_v12 = vpop.f32.mrf.mxu0 }
 0x1ed   : > { %v620_v13 = vmax.f32 %v617_v11, 0.0 }
 0x1ef   : > { %1398 = vmatprep.subr.mxu1 %v620_v13 }
 0x1f0   : > { %1399 = vmatpush3.msra.mxu1 %v620_v13 }
 0x1f1   : > { %1401 = vmatmul.mubr.msk.f32.vlgmr.msra.gmra.mxu1 %vm733_vm2, %v622_v14  ;;  %v721_v14 = vpop.permute.xlu1 %720 }
 0x1f2   : > { %1403 = vmatprep.mubr.msk.f32.mxu1 %vm733_vm2, %v623_v15 }
 0x1f5   : > { %1404 = vmatmul.mubr.msk.f32.gmra.mxu1 %vm733_vm2, %v624_v16 }
 0x1f6   : > { %1406 = vmatprep.mubr.msk.f32.mxu1 %vm733_vm2, %v625_v17 }
 0x1f9   : > { %1407 = vmatmul.mubr.msk.f32.gmra.mxu1 %vm733_vm2, %v626_v18 }
 0x1fa   : > { %1409 = vmatprep.mubr.msk.f32.mxu1 %vm733_vm2, %v627_v19 }
 0x1fd   : > { %1410 = vmatmul.mubr.msk.f32.gmra.mxu1 %vm733_vm2, %v628_v20  ;;  %v716_v20 = vpop.permute.xlu0 %715 }
 0x1fe   : > { %1412 = vmatprep.mubr.msk.f32.mxu1 %vm733_vm2, %v629_v21 }
 0x201   : > { %1413 = vmatmul.mubr.msk.f32.gmra.mxu1 %vm733_vm2, %v630_v22 }
 0x202   : > { %1415 = vmatprep.mubr.msk.f32.mxu1 %vm733_vm2, %v631_v23 }
 0x205   : > { %1416 = vmatmul.mubr.msk.f32.gmra.mxu1 %vm733_vm2, %v632_v24 }
 0x206   : > { %1418 = vmatprep.mubr.msk.f32.mxu1 %vm733_vm2, %v633_v25 }
 0x209   : > { %1419 = vmatmul.mubr.msk.f32.gmra.mxu1 %vm733_vm2, %v634_v27 }
 0x20a   : > { %1421 = vmatprep.mubr.msk.f32.mxu1 %vm733_vm2, %v635_v28 }
 0x20d   : > { %1422 = vmatmul.mubr.msk.f32.gmra.mxu1 %vm733_vm2, %v636_v29 }
 0x2b1   : > { %v1402_v37 = vpop.f32.mrf.mxu1 }
 0x2b2   : > { %v854_v38 = vadd.f32 %v1402_v37, %v661_v31  ;;  %v731_v31 = vpop.permute.xlu1 %730 }
 0x2b3   : > { %v848_v39 = vpop.f32.mrf.mxu1 }
 0x2b4   : > { %v1295_v40 = vmul.f32 -1.442695, %v854_v38  ;;  %v849_v41 = vadd.f32 %v848_v39, %v656_v30  ;;  %v726_v38 = vpop.permute.xlu0 %725 }
 0x2b5   : > { %v1405_v43 = vpop.f32.mrf.mxu1 }
 0x2b6   : > { %1505 = vpow2.f32 %v1295_v40  ;;  %v1294_v44 = vmul.f32 -1.442695, %v849_v41  ;;  %v864_v45 = vadd.f32 %v1405_v43, %v671_v33 }
 0x2b7   : > { %v858_v46 = vpop.f32.mrf.mxu1 }
 0x2b8   : > { %1507 = vpow2.f32 %v1294_v44  ;;  %v1297_v47 = vmul.f32 -1.442695, %v864_v45  ;;  %v859_v48 = vadd.f32 %v858_v46, %v666_v32 }
 0x2b9   : > { %v1408_v49 = vpop.f32.mrf.mxu1 }
 0x2ba   : > { %1509 = vpow2.f32 %v1297_v47  ;;  %v1296_v50 = vmul.f32 -1.442695, %v859_v48  ;;  %v874_v51 = vadd.f32 %v1408_v49, %v681_v35 }
 0x2bb   : > { %v868_v53 = vpop.f32.mrf.mxu1 }
 0x2bc   : > { %1511 = vpow2.f32 %v1296_v50  ;;  %v1299_v54 = vmul.f32 -1.442695, %v874_v51  ;;  %v869_v55 = vadd.f32 %v868_v53, %v676_v34 }
 0x2bd   : > { %v1411_v57 = vpop.f32.mrf.mxu1 }
 0x2be   : > { %1513 = vpow2.f32 %v1299_v54  ;;  %v1298_v59 = vmul.f32 -1.442695, %v869_v55  ;;  %v884_v60 = vadd.f32 %v1411_v57, %v691_v42 }
 0x2bf   : > { %v878_v61 = vpop.f32.mrf.mxu1 }
 0x2c0   : > { %1515 = vpow2.f32 %v1298_v59  ;;  %v1301_v62 = vmul.f32 -1.442695, %v884_v60  ;;  %v879_v63 = vadd.f32 %v878_v61, %v686_v36 }
 0x2c1   : > { %v1414_v58 = vpop.f32.mrf.mxu1 }
 0x2c2   : > { %1517 = vpow2.f32 %v1301_v62  ;;  %v1300_v0 = vmul.f32 -1.442695, %v879_v63  ;;  %v894_v1 = vadd.f32 %v1414_v58, %v701_v52 }
 0x2c3   : > { %v1506_v2 = vpop.eup %1505  ;;  %v888_v4 = vpop.f32.mrf.mxu1 }
 0x2c4   : > { %v976_v5 = vadd.f32 1.0, %v1506_v2  ;;  %1519 = vpow2.f32 %v1300_v0  ;;  %v1303_v6 = vmul.f32 -1.442695, %v894_v1  ;;  %v889_v7 = vadd.f32 %v888_v4, %v696_v56 }
 0x2c5   : > { %v1508_v8 = vpop.eup %1507  ;;  %v1417_v9 = vpop.f32.mrf.mxu1 }
 0x2c6   : > { %1521 = vrcp.f32 %v976_v5  ;;  %v975_v10 = vadd.f32 1.0, %v1508_v8  ;;  %v1302_v11 = vmul.f32 -1.442695, %v889_v7  ;;  %v904_v12 = vadd.f32 %v1417_v9, %v711_v26 }
 0x2c7   : > { %v1510_v13 = vpop.eup %1509  ;;  %1523 = vpow2.f32 %v1303_v6  ;;  %v898_v15 = vpop.f32.mrf.mxu1 }
 0x2c8   : > { %1525 = vrcp.f32 %v975_v10  ;;  %v978_v16 = vadd.f32 1.0, %v1510_v13  ;;  %v1305_v17 = vmul.f32 -1.442695, %v904_v12  ;;  %v899_v18 = vadd.f32 %v898_v15, %v706_v3 }
 0x2c9   : > { %v1512_v19 = vpop.eup %1511  ;;  %1527 = vpow2.f32 %v1302_v11  ;;  %v1420_v21 = vpop.f32.mrf.mxu1 }
 0x2ca   : > { %1529 = vrcp.f32 %v978_v16  ;;  %v977_v22 = vadd.f32 1.0, %v1512_v19  ;;  %v1304_v23 = vmul.f32 -1.442695, %v899_v18  ;;  %v914_v24 = vadd.f32 %v1420_v21, %v721_v14 }
 0x2cb   : > { %v1514_v25 = vpop.eup %1513  ;;  %1531 = vpow2.f32 %v1305_v17  ;;  %v908_v27 = vpop.f32.mrf.mxu1 }
 0x2cc   : > { %1533 = vrcp.f32 %v977_v22  ;;  %v1307_v28 = vmul.f32 -1.442695, %v914_v24  ;;  %v909_v29 = vadd.f32 %v908_v27, %v716_v20  ;;  %v980_v33 = vadd.f32 1.0, %v1514_v25 }
 0x2cd   : > { %v1516_v30 = vpop.eup %1515  ;;  %1535 = vpow2.f32 %v1304_v23  ;;  %v1423_v32 = vpop.f32.mrf.mxu1 }
 0x2ce   : > { %v979_v34 = vadd.f32 1.0, %v1516_v30  ;;  %v1306_v35 = vmul.f32 -1.442695, %v909_v29  ;;  %v924_v36 = vadd.f32 %v1423_v32, %v731_v31  ;;  %1537 = vpow2.f32 %v1307_v28 }
 0x2cf   : > { %v1518_v37 = vpop.eup %1517  ;;  %v918_v39 = vpop.f32.mrf.mxu1 }
 0x2d0   : > { %1539 = vrcp.f32 %v979_v34  ;;  %v1309_v40 = vmul.f32 -1.442695, %v924_v36  ;;  %v919_v41 = vadd.f32 %v918_v39, %v726_v38  ;;  %v982_v43 = vadd.f32 1.0, %v1518_v37 }
 0x2d1   : > { %v1520_v42 = vpop.eup %1519  ;;  %1541 = vpow2.f32 %v1306_v35 }
 0x2d2   : > { %1543 = vrcp.f32 %v980_v33  ;;  %v981_v44 = vadd.f32 1.0, %v1520_v42  ;;  %v1308_v45 = vmul.f32 -1.442695, %v919_v41 }
 0x2d3   : > { %v1522_v46 = vpop.eup %1521  ;;  %1545 = vpow2.f32 %v1309_v40 }
 0x2d4   : > { %v1524_v47 = vpop.eup %1523  ;;  %1547 = vrcp.f32 %v981_v44  ;;  %v1027_v48 = vsel %vm1023_vm3, %v1522_v46, 0.0 }
 0x2d5   : > { %v1526_v49 = vpop.eup %1525  ;;  %1549 = vpow2.f32 %v1308_v45  ;;  %1028 = vadd.xlane.f32.xlu1 %v1027_v48  ;;  %v984_v51 = vadd.f32 1.0, %v1524_v47 }
 0x2d6   : > { %v1528_v50 = vpop.eup %1527  ;;  %1551 = vrcp.f32 %v982_v43  ;;  %v1024_v52 = vsel %vm1023_vm3, %v1526_v49, 0.0 }
 0x2d7   : > { %v1530_v53 = vpop.eup %1529  ;;  %v983_v54 = vadd.f32 1.0, %v1528_v50  ;;  %1025 = vadd.xlane.f32.xlu0 %v1024_v52 }
 0x2d8   : > { %v1532_v55 = vpop.eup %1531  ;;  %v1033_v60 = vsel %vm1023_vm3, %v1530_v53, 0.0 }
 0x2d9   : > { %v1534_v56 = vpop.eup %1533  ;;  %1553 = vrcp.f32 %v983_v54  ;;  %v986_v59 = vadd.f32 1.0, %v1532_v55 }
 0x2da   : > { %v1536_v57 = vpop.eup %1535  ;;  %1555 = vrcp.f32 %v984_v51  ;;  %v1030_v0 = vsel %vm1023_vm3, %v1534_v56, 0.0 }
 0x2db   : > { %v985_v61 = vadd.f32 1.0, %v1536_v57  ;;  %1034 = vadd.xlane.f32.xlu0 %v1033_v60  ;;  %v1538_v62 = vpop.eup %1537 }
 0x2dc   : > { %v988_v58 = vadd.f32 1.0, %v1538_v62 }
 0x2dd   : > { %v1540_v63 = vpop.eup %1539  ;;  %1557 = vrcp.f32 %v985_v61 }
 0x2de   : > { %v1542_v26 = vpop.eup %1541  ;;  %1559 = vrcp.f32 %v986_v59  ;;  %v1036_v1 = vsel %vm1023_vm3, %v1540_v63, 0.0 }
 0x2df   : > { %v1544_v2 = vpop.eup %1543  ;;  %v987_v3 = vadd.f32 1.0, %v1542_v26  ;;  %1031 = vadd.xlane.f32.xlu0 %v1030_v0  ;;  %1037 = vadd.xlane.f32.xlu1 %v1036_v1 }
 0x2e0   : > { %v1546_v4 = vpop.eup %1545  ;;  %v1039_v8 = vsel %vm1023_vm3, %v1544_v2, 0.0 }
 0x2e1   : > { %v1548_v5 = vpop.eup %1547  ;;  %1561 = vrcp.f32 %v987_v3  ;;  %v990_v7 = vadd.f32 1.0, %v1546_v4 }
 0x2e2   : > { %v1550_v6 = vpop.eup %1549  ;;  %1563 = vrcp.f32 %v988_v58  ;;  %v1042_v9 = vsel %vm1023_vm3, %v1548_v5, 0.0 }
 0x2e3   : > { %v1552_v10 = vpop.eup %1551  ;;  %v989_v11 = vadd.f32 1.0, %v1550_v6  ;;  %1040 = vadd.xlane.f32.xlu0 %v1039_v8  ;;  %1043 = vadd.xlane.f32.xlu1 %v1042_v9 }
 0x2e4   : > { %v1045_v13 = vsel %vm1023_vm3, %v1552_v10, 0.0 }
 0x2e5   : > { %1565 = vrcp.f32 %v989_v11 }
 0x2e6   : > { %v1554_v12 = vpop.eup %1553  ;;  %1567 = vrcp.f32 %v990_v7 }
 0x2e7   : > { %v1556_v14 = vpop.eup %1555  ;;  %v1048_v15 = vsel %vm1023_vm3, %v1554_v12, 0.0  ;;  %1046 = vadd.xlane.f32.xlu0 %v1045_v13 }
 0x2e8   : > { %1049 = vadd.xlane.f32.xlu1 %v1048_v15  ;;  %v1051_v17 = vsel %vm1023_vm3, %v1556_v14, 0.0 }
 0x2ea   : > { %v1558_v16 = vpop.eup %1557 }
 0x2eb   : > { %v1560_v18 = vpop.eup %1559  ;;  %v1054_v19 = vsel %vm1023_vm3, %v1558_v16, 0.0  ;;  %1052 = vadd.xlane.f32.xlu0 %v1051_v17 }
 0x2ec   : > { %1055 = vadd.xlane.f32.xlu1 %v1054_v19  ;;  %v1057_v21 = vsel %vm1023_vm3, %v1560_v18, 0.0 }
 0x2ee   : > { %v1562_v20 = vpop.eup %1561 }
 0x2ef   : > { %v1564_v22 = vpop.eup %1563  ;;  %v1060_v23 = vsel %vm1023_vm3, %v1562_v20, 0.0  ;;  %1058 = vadd.xlane.f32.xlu0 %v1057_v21 }
 0x2f0   : > { %1061 = vadd.xlane.f32.xlu1 %v1060_v23  ;;  %v1063_v25 = vsel %vm1023_vm3, %v1564_v22, 0.0 }
 0x2f2   : > { %v1566_v24 = vpop.eup %1565 }
 0x2f3   : > { %v1568_v27 = vpop.eup %1567  ;;  %v1066_v28 = vsel %vm1023_vm3, %v1566_v24, 0.0  ;;  %1064 = vadd.xlane.f32.xlu0 %v1063_v25 }
 0x2f4   : > { %1067 = vadd.xlane.f32.xlu1 %v1066_v28  ;;  %v1069_v29 = vsel %vm1023_vm3, %v1568_v27, 0.0 }
 0x2f7   : > { %1070 = vadd.xlane.f32.xlu0 %v1069_v29 }
 0x35e   : > { %v1029_v30 = vpop.xlane.xlu1 %1028 }
 0x35f   : > { %v1311_v31 = vmul.f32 -1.442695, %v1029_v30 }
 0x360   : > { %v1026_v32 = vpop.xlane.xlu0 %1025 }
 0x361   : > { %1569 = vpow2.f32 %v1311_v31  ;;  %v1310_v33 = vmul.f32 -1.442695, %v1026_v32 }
 0x363   : > { %1571 = vpow2.f32 %v1310_v33 }
 0x364   : > { %v1035_v34 = vpop.xlane.xlu0 %1034 }
 0x365   : > { %v1313_v35 = vmul.f32 -1.442695, %v1035_v34 }
 0x367   : > { %1573 = vpow2.f32 %v1313_v35 }
 0x368   : > { %v1032_v36 = vpop.xlane.xlu0 %1031  ;;  %v1038_v37 = vpop.xlane.xlu1 %1037 }
 0x369   : > { %v1312_v38 = vmul.f32 -1.442695, %v1032_v36  ;;  %v1314_v39 = vmul.f32 -1.442695, %v1038_v37 }
 0x36b   : > { %1575 = vpow2.f32 %v1312_v38 }
 0x36c   : > { %1577 = vpow2.f32 %v1314_v39  ;;  %v1041_v40 = vpop.xlane.xlu0 %1040  ;;  %v1044_v41 = vpop.xlane.xlu1 %1043 }
 0x36d   : > { %v1315_v42 = vmul.f32 -1.442695, %v1041_v40  ;;  %v1316_v43 = vmul.f32 -1.442695, %v1044_v41 }
 0x36e   : > { %v1570_v44 = vpop.eup %1569 }
 0x36f   : > { %v1121_v45 = vadd.f32 1.0, %v1570_v44  ;;  %1579 = vpow2.f32 %v1315_v42 }
 0x370   : > { %v1572_v46 = vpop.eup %1571  ;;  %1581 = vpow2.f32 %v1316_v43  ;;  %v1047_v47 = vpop.xlane.xlu0 %1046 }
 0x371   : > { %1583 = vrcp.f32 %v1121_v45  ;;  %v1120_v48 = vadd.f32 1.0, %v1572_v46  ;;  %v1317_v49 = vmul.f32 -1.442695, %v1047_v47  ;;  %v1050_v50 = vpop.xlane.xlu1 %1049 }
 0x372   : > { %v1318_v51 = vmul.f32 -1.442695, %v1050_v50 }
 0x373   : > { %1585 = vrcp.f32 %v1120_v48 }
 0x374   : > { %v1574_v52 = vpop.eup %1573  ;;  %1587 = vpow2.f32 %v1317_v49  ;;  %v1053_v53 = vpop.xlane.xlu0 %1052 }
 0x375   : > { %v1123_v54 = vadd.f32 1.0, %v1574_v52  ;;  %1589 = vpow2.f32 %v1318_v51  ;;  %v1319_v55 = vmul.f32 -1.442695, %v1053_v53  ;;  %v1056_v56 = vpop.xlane.xlu1 %1055 }
 0x376   : > { %v1320_v57 = vmul.f32 -1.442695, %v1056_v56 }
 0x377   : > { %1591 = vrcp.f32 %v1123_v54 }
 0x378   : > { %v1576_v59 = vpop.eup %1575  ;;  %1593 = vpow2.f32 %v1319_v55  ;;  %v1059_v60 = vpop.xlane.xlu0 %1058 }
 0x379   : > { %v1578_v61 = vpop.eup %1577  ;;  %v1122_v62 = vadd.f32 1.0, %v1576_v59  ;;  %1595 = vpow2.f32 %v1320_v57  ;;  %v1321_v63 = vmul.f32 -1.442695, %v1059_v60  ;;  %v1062_v26 = vpop.xlane.xlu1 %1061 }
 0x37a   : > { %v1124_v58 = vadd.f32 1.0, %v1578_v61  ;;  %v1322_v0 = vmul.f32 -1.442695, %v1062_v26 }
 0x37b   : > { %1597 = vrcp.f32 %v1122_v62 }
 0x37c   : > { %v1580_v1 = vpop.eup %1579  ;;  %1599 = vrcp.f32 %v1124_v58  ;;  %v1065_v2 = vpop.xlane.xlu0 %1064 }
 0x37d   : > { %v1582_v3 = vpop.eup %1581  ;;  %v1125_v4 = vadd.f32 1.0, %v1580_v1  ;;  %1601 = vpow2.f32 %v1321_v63  ;;  %v1323_v5 = vmul.f32 -1.442695, %v1065_v2  ;;  %v1068_v6 = vpop.xlane.xlu1 %1067 }
 0x37e   : > { %v1584_v7 = vpop.eup %1583  ;;  %v1126_v8 = vadd.f32 1.0, %v1582_v3  ;;  %1603 = vpow2.f32 %v1322_v0  ;;  %v1324_v9 = vmul.f32 -1.442695, %v1068_v6 }
 0x37f   : > { %1170 = vst.msk [vmem:[%s1869_s26 + $0x8] sm:$0xff] %vm1168_vm4, %v1584_v7  ;;  %1605 = vrcp.f32 %v1125_v4 }
 0x380   : > { %v1586_v10 = vpop.eup %1585  ;;  %1607 = vrcp.f32 %v1126_v8  ;;  %v1071_v11 = vpop.xlane.xlu0 %1070 }
 0x381   : > { %v1588_v12 = vpop.eup %1587  ;;  %1169 = vst.msk [vmem:[%s1869_s26] sm:$0xff] %vm1168_vm4, %v1586_v10  ;;  %1609 = vpow2.f32 %v1323_v5  ;;  %v1325_v13 = vmul.f32 -1.442695, %v1071_v11 }
 0x382   : > { %v1590_v14 = vpop.eup %1589  ;;  %v1127_v15 = vadd.f32 1.0, %v1588_v12  ;;  %1611 = vpow2.f32 %v1324_v9 }
 0x383   : > { %v1128_v16 = vadd.f32 1.0, %v1590_v14  ;;  %1613 = vpow2.f32 %v1325_v13 }
 0x384   : > { %v1592_v17 = vpop.eup %1591  ;;  %1615 = vrcp.f32 %v1127_v15 }
 0x385   : > { %v1594_v18 = vpop.eup %1593  ;;  %1172 = vst.msk [vmem:[%s1869_s26 + $0x18] sm:$0xff] %vm1168_vm4, %v1592_v17  ;;  %1617 = vrcp.f32 %v1128_v16 }
 0x386   : > { %v1596_v19 = vpop.eup %1595  ;;  %v1129_v20 = vadd.f32 1.0, %v1594_v18 }
 0x387   : > { %v1130_v21 = vadd.f32 1.0, %v1596_v19 }
 0x388   : > { %v1598_v22 = vpop.eup %1597  ;;  %1619 = vrcp.f32 %v1129_v20 }
 0x389   : > { %v1600_v23 = vpop.eup %1599  ;;  %1171 = vst.msk [vmem:[%s1869_s26 + $0x10] sm:$0xff] %vm1168_vm4, %v1598_v22  ;;  %1621 = vrcp.f32 %v1130_v21 }
 0x38a   : > { %v1602_v24 = vpop.eup %1601  ;;  %1173 = vst.msk [vmem:[%s1869_s26 + $0x20] sm:$0xff] %vm1168_vm4, %v1600_v23 }
 0x38b   : > { %v1604_v25 = vpop.eup %1603  ;;  %v1131_v27 = vadd.f32 1.0, %v1602_v24 }
 0x38c   : > { %v1606_v28 = vpop.eup %1605  ;;  %v1132_v29 = vadd.f32 1.0, %v1604_v25 }
 0x38d   : > { %v1608_v30 = vpop.eup %1607  ;;  %1174 = vst.msk [vmem:[%s1869_s26 + $0x28] sm:$0xff] %vm1168_vm4, %v1606_v28  ;;  %1623 = vrcp.f32 %v1131_v27 }
 0x38e   : > { %v1610_v31 = vpop.eup %1609  ;;  %1175 = vst.msk [vmem:[%s1869_s26 + $0x30] sm:$0xff] %vm1168_vm4, %v1608_v30  ;;  %1625 = vrcp.f32 %v1132_v29 }
 0x38f   : > { %v1612_v32 = vpop.eup %1611  ;;  %v1133_v33 = vadd.f32 1.0, %v1610_v31 }
 0x390   : > { %v1614_v34 = vpop.eup %1613  ;;  %v1134_v35 = vadd.f32 1.0, %v1612_v32 }
 0x391   : > { %v1616_v36 = vpop.eup %1615  ;;  %1627 = vrcp.f32 %v1133_v33  ;;  %v1135_v37 = vadd.f32 1.0, %v1614_v34 }
 0x392   : > { %v1618_v38 = vpop.eup %1617  ;;  %1176 = vst.msk [vmem:[%s1869_s26 + $0x38] sm:$0xff] %vm1168_vm4, %v1616_v36  ;;  %1629 = vrcp.f32 %v1134_v35 }
 0x393   : > { %1177 = vst.msk [vmem:[%s1869_s26 + $0x40] sm:$0xff] %vm1168_vm4, %v1618_v38  ;;  %1631 = vrcp.f32 %v1135_v37 }
 0x395   : > { %v1620_v39 = vpop.eup %1619 }
 0x396   : > { %v1622_v40 = vpop.eup %1621  ;;  %1178 = vst.msk [vmem:[%s1869_s26 + $0x48] sm:$0xff] %vm1168_vm4, %v1620_v39 }
 0x397   : > { %1179 = vst.msk [vmem:[%s1869_s26 + $0x50] sm:$0xff] %vm1168_vm4, %v1622_v40 }
 0x39a   : > { %v1624_v41 = vpop.eup %1623 }
 0x39b   : > { %v1626_v42 = vpop.eup %1625  ;;  %1180 = vst.msk [vmem:[%s1869_s26 + $0x58] sm:$0xff] %vm1168_vm4, %v1624_v41 }
 0x39c   : > { %1181 = vst.msk [vmem:[%s1869_s26 + $0x60] sm:$0xff] %vm1168_vm4, %v1626_v42 }
 0x39e   : > { %v1628_v43 = vpop.eup %1627 }
 0x39f   : > { %v1630_v44 = vpop.eup %1629  ;;  %1182 = vst.msk [vmem:[%s1869_s26 + $0x68] sm:$0xff] %vm1168_vm4, %v1628_v43 }
 0x3a0   : > { %v1632_v45 = vpop.eup %1631  ;;  %1183 = vst.msk [vmem:[%s1869_s26 + $0x70] sm:$0xff] %vm1168_vm4, %v1630_v44 }
 0x3a1   : > { %1184 = vst.msk [vmem:[%s1869_s26 + $0x78] sm:$0xff] %vm1168_vm4, %v1632_v45 }
 0x3a2 PF: > { %s18_s25 = sadd.s32 1, %s1727_s25   ;;  %s2196_s27 = sld [smem:[#allocation7_spill]] }
 0x3a3   : > { %p15_p11 = scmp.ge.s32.totalorder %s18_s25, 6   ;;  %s2197_s28 = sld [smem:[#allocation8_spill]] }
 0x3a4   : > { %s2198_s18 = smov %s1703_s19  ;;  %s2199_s19 = smov %s1707_s20 }
 0x3a5   : > { %s2200_s20 = smov %s1835_s13  ;;  %s2201_s21 = smov %s1719_s23 }
 0x3a6   : > { %s2202_s22 = smov %s1723_s24  ;;  %17 = sbr.rel (!%p15_p11) target bundleno = 5 (0x5), region = 88 }
 0x3a8   : > { %s2203_s23 = smov %s2196_s27 }
 0x3a9   : > { %s2204_s24 = smov %s2197_s28 }
 0x3ab   :  { %1206 = vsyncpa [#allocation5], 1 }
 0x3ac   :  { %1208 = vsyncpa [#allocation5 + $0x1], 1 }

</bundles_post_ra>
